<compile_context>
chip_gen: v6e
topology: v6e:2x2x1
jax: 0.10.0
libtpu: 0.0.40
codegen_flags: <defaults>
</compile_context>

<pallas_src>
import functools

import jax
import jax.numpy as jnp
from jax.experimental import pallas as pl
from jax.experimental.pallas import tpu as pltpu

LN_EPS = 1e-5  # torch.nn.LayerNorm default


def _round_up(a, b):
    return (a + b - 1) // b * b


def _vmem_capacity_bytes():
    """Physical VMEM per core; conservative fallback if the query fails."""
    try:
        info = pltpu.get_tpu_info()
        for attr in ("vmem_capacity_bytes", "vmem_bytes", "vmem_size_bytes"):
            v = getattr(info, attr, None)
            if v:
                return int(v)
    except Exception:
        pass
    return 64 << 20  # v7x-sized fallback; safe on every generation


def _layer_norm_f32(y, gamma, beta, d_model, d_pad):
    """LayerNorm over the last axis; masks padded lanes when d_pad > d_model."""
    if d_model == d_pad:
        mean = jnp.mean(y, axis=-1, keepdims=True)
        c = y - mean
        var = jnp.mean(c * c, axis=-1, keepdims=True)
    else:
        lane = jax.lax.broadcasted_iota(jnp.int32, y.shape, 1)
        mask = lane < d_model
        mean = jnp.sum(jnp.where(mask, y, 0.0), axis=-1, keepdims=True) / d_model
        c = jnp.where(mask, y - mean, 0.0)
        var = jnp.sum(c * c, axis=-1, keepdims=True) / d_model
    y_norm = c * jax.lax.rsqrt(var + LN_EPS)
    return y_norm * gamma + beta


# --------------------------------------------------------------------------
# Kernel 1: weights fully resident in VMEM, single pass per row tile.
# Grid = (row_tiles,). Weight index_maps are constant -> fetched once.
# --------------------------------------------------------------------------
def ffn_resident_kernel(x_ref, w1_ref, b1_ref, w2_ref, b2_ref, g_ref, beta_ref,
                        o_ref, *, d_model, d_pad):
    x = x_ref[...]  # (tm, D_pad) in the caller's dtype (bf16 stays bf16)

    h = jnp.dot(x, w1_ref[...], preferred_element_type=jnp.float32)
    h = jnp.maximum(h + b1_ref[...].astype(jnp.float32), 0.0)

    y = jnp.dot(h.astype(w2_ref.dtype), w2_ref[...],
                preferred_element_type=jnp.float32)
    y = y + b2_ref[...].astype(jnp.float32) + x.astype(jnp.float32)

    out = _layer_norm_f32(y, g_ref[...].astype(jnp.float32),
                          beta_ref[...].astype(jnp.float32), d_model, d_pad)
    o_ref[...] = out.astype(o_ref.dtype)


# --------------------------------------------------------------------------
# Kernel 2: H-chunked fallback with an f32 accumulator in VMEM scratch.
# Grid = (row_tiles, h_chunks), h (reduction) last / "arbitrary".
# --------------------------------------------------------------------------
def ffn_chunked_kernel(x_ref, w1_ref, b1_ref, w2_ref, b2_ref, g_ref, beta_ref,
                       o_ref, acc_ref, *, d_model, d_pad):
    hk = pl.program_id(1)

    @pl.when(hk == 0)
    def _init():
        acc_ref[...] = jnp.zeros_like(acc_ref)

    x = x_ref[...]  # (tm, D_pad)

    h = jnp.dot(x, w1_ref[...], preferred_element_type=jnp.float32)
    h = jnp.maximum(h + b1_ref[...].astype(jnp.float32), 0.0)

    acc_ref[...] += jnp.dot(h.astype(w2_ref.dtype), w2_ref[...],
                            preferred_element_type=jnp.float32)

    @pl.when(hk == pl.num_programs(1) - 1)
    def _finalize():
        y = acc_ref[...] + b2_ref[...].astype(jnp.float32) + x.astype(jnp.float32)
        out = _layer_norm_f32(y, g_ref[...].astype(jnp.float32),
                              beta_ref[...].astype(jnp.float32), d_model, d_pad)
        o_ref[...] = out.astype(o_ref.dtype)


def position_wise_feed_forward(x, w1, b1, w2, b2, gamma, beta, *,
                               tm=None, h_chunk=None):
    """x: (B, S, D).  w1: (D, H), w2: (H, D) (pre-transposed).  Returns (B, S, D)."""
    B, S, D = x.shape
    H = w1.shape[1]
    rows = B * S
    x_item = x.dtype.itemsize
    w_item = w1.dtype.itemsize

    D_pad = _round_up(D, 128)
    H_full = _round_up(H, 128)

    # ---------------- VMEM budget & tile selection ----------------
    vmem_cap = _vmem_capacity_bytes()
    vmem_target = max(min(int(vmem_cap * 0.85), vmem_cap - (12 << 20)), 24 << 20)

    def resident_bytes(t):
        return (4 * t * D_pad * x_item                       # x + out, double-buffered
                + 2 * (D_pad * H_full + H_full * D_pad) * w_item
                + t * H_full * 4                             # fc1 activation (f32)
                + 2 * t * D_pad * 4                          # f32 intermediates
                + 4 * 8 * max(D_pad, H_full) * 4)            # biases / LN params

    def chunked_bytes(t, hk):
        return (4 * t * D_pad * x_item
                + 2 * (D_pad * hk + hk * D_pad) * w_item
                + t * D_pad * 4                              # f32 accumulator
                + t * hk * 4                                 # fc1 activation chunk
                + 4 * 8 * max(D_pad, hk) * 4)

    rows8 = _round_up(rows, 8)
    tm_candidates = [t for t in (1024, 512, 256, 128, 64, 32, 16, 8)
                     if t <= max(rows8, 8)] or [8]

    HK = min(_round_up(h_chunk, 128), H_full) if h_chunk is not None else None

    if tm is None and HK is None:
        # Prefer fully-resident weights (no H axis, no accumulator RMW).
        tm_sel = next((t for t in tm_candidates
                       if resident_bytes(t) <= vmem_target), None)
        if tm_sel is not None:
            tm, HK = tm_sel, H_full
        else:
            hk_cands = [h for h in (2048, 1024, 512, 256, 128) if h <= H_full] or [128]
            pick = None
            for t in tm_candidates:            # tm first: arithmetic-intensity lever
                for hk in hk_cands:            # then the largest H chunk that fits
                    if chunked_bytes(t, hk) <= vmem_target:
                        pick = (t, hk)
                        break
                if pick:
                    break
            tm, HK = pick if pick else (8, 128)
    elif tm is None:
        tm = next((t for t in tm_candidates
                   if chunked_bytes(t, HK) <= vmem_target), 8)
    elif HK is None:
        HK = H_full if resident_bytes(min(tm, rows8)) <= vmem_target else min(512, H_full)

    single_pass = HK >= H_full
    H_pad = H_full if single_pass else _round_up(H_full, HK)

    # Keep >=2 row tiles when possible so both v7x TensorCores get work.
    if rows >= 16:
        row_target = _round_up(-(-rows // 2), 8)
    else:
        row_target = _round_up(max(rows, 1), 8)
    tm_eff = _round_up(max(min(tm, row_target), 8), 8)
    rows_pad = _round_up(rows, tm_eff)

    # ---------------- operand padding (skipped when already aligned) -------
    # TODO(synk): in a real model, pad/pre-transpose the weights once at
    # parameter-prep time instead of per forward call.
    x2 = x.reshape(rows, D)
    if rows_pad != rows or D_pad != D:
        x2 = jnp.pad(x2, ((0, rows_pad - rows), (0, D_pad - D)))
    w1p = w1 if (D_pad == D and H_pad == H) else jnp.pad(
        w1, ((0, D_pad - D), (0, H_pad - H)))
    w2p = w2 if (H_pad == H and D_pad == D) else jnp.pad(
        w2, ((0, H_pad - H), (0, D_pad - D)))
    b1p = b1.reshape(1, H)
    if H_pad != H:
        b1p = jnp.pad(b1p, ((0, 0), (0, H_pad - H)))
    b2p, gp, bp = b2.reshape(1, D), gamma.reshape(1, D), beta.reshape(1, D)
    if D_pad != D:
        padw = ((0, 0), (0, D_pad - D))
        b2p, gp, bp = jnp.pad(b2p, padw), jnp.pad(gp, padw), jnp.pad(bp, padw)

    # ---------------- cost / VMEM limits ----------------
    num_row_tiles = rows_pad // tm_eff
    budget = resident_bytes(tm_eff) if single_pass else chunked_bytes(tm_eff, HK)
    vmem_limit = int(min(max(int(budget * 1.5), 32 << 20), vmem_target))

    weight_bytes_once = (D_pad * H_pad + H_pad * D_pad) * w_item
    weight_traffic = weight_bytes_once if single_pass else num_row_tiles * weight_bytes_once
    cost = pl.CostEstimate(
        flops=4 * rows * D * H,                # 2 matmuls x 2 flops/MAC
        transcendentals=rows,                  # one rsqrt per row
        bytes_accessed=int(2 * rows_pad * D_pad * x_item + weight_traffic
                           + (H_pad + 3 * D_pad) * 4),
    )

    # ---------------- pallas_call ----------------
    if single_pass:
        kernel = functools.partial(ffn_resident_kernel, d_model=D, d_pad=D_pad)
        out2 = pl.pallas_call(
            kernel,
            out_shape=jax.ShapeDtypeStruct((rows_pad, D_pad), x.dtype),
            grid_spec=pltpu.PrefetchScalarGridSpec(
                num_scalar_prefetch=0,
                grid=(num_row_tiles,),
                in_specs=[
                    pl.BlockSpec((tm_eff, D_pad), lambda i: (i, 0)),  # x row tile
                    pl.BlockSpec((D_pad, H_pad), lambda i: (0, 0)),   # W1 (resident)
                    pl.BlockSpec((1, H_pad), lambda i: (0, 0)),       # b1
                    pl.BlockSpec((H_pad, D_pad), lambda i: (0, 0)),   # W2 (resident)
                    pl.BlockSpec((1, D_pad), lambda i: (0, 0)),       # b2
                    pl.BlockSpec((1, D_pad), lambda i: (0, 0)),       # LN gamma
                    pl.BlockSpec((1, D_pad), lambda i: (0, 0)),       # LN beta
                ],
                out_specs=pl.BlockSpec((tm_eff, D_pad), lambda i: (i, 0)),
            ),
            compiler_params=pltpu.CompilerParams(
                dimension_semantics=("parallel",),
                vmem_limit_bytes=vmem_limit),
            cost_estimate=cost,
        )(x2, w1p, b1p, w2p, b2p, gp, bp)
    else:
        kernel = functools.partial(ffn_chunked_kernel, d_model=D, d_pad=D_pad)
        out2 = pl.pallas_call(
            kernel,
            out_shape=jax.ShapeDtypeStruct((rows_pad, D_pad), x.dtype),
            grid_spec=pltpu.PrefetchScalarGridSpec(
                num_scalar_prefetch=0,
                grid=(num_row_tiles, H_pad // HK),
                in_specs=[
                    pl.BlockSpec((tm_eff, D_pad), lambda i, h: (i, 0)),  # x row tile
                    pl.BlockSpec((D_pad, HK), lambda i, h: (0, h)),      # W1 chunk
                    pl.BlockSpec((1, HK), lambda i, h: (0, h)),          # b1 chunk
                    pl.BlockSpec((HK, D_pad), lambda i, h: (h, 0)),      # W2 chunk
                    pl.BlockSpec((1, D_pad), lambda i, h: (0, 0)),       # b2
                    pl.BlockSpec((1, D_pad), lambda i, h: (0, 0)),       # LN gamma
                    pl.BlockSpec((1, D_pad), lambda i, h: (0, 0)),       # LN beta
                ],
                out_specs=pl.BlockSpec((tm_eff, D_pad), lambda i, h: (i, 0)),
                scratch_shapes=[pltpu.VMEM((tm_eff, D_pad), jnp.float32)],
            ),
            compiler_params=pltpu.CompilerParams(
                dimension_semantics=("parallel", "arbitrary"),
                vmem_limit_bytes=vmem_limit),
            cost_estimate=cost,
        )(x2, w1p, b1p, w2p, b2p, gp, bp)

    if rows_pad != rows or D_pad != D:
        out2 = out2[:rows, :D]
    return out2.reshape(B, S, D)


# --------------------------------------------------------------------------
# Reference + tests
# --------------------------------------------------------------------------
def _reference(x, w1, b1, w2, b2, gamma, beta):
    hi = jax.lax.Precision.HIGHEST
    x32 = x.astype(jnp.float32)
    h = jnp.maximum(jnp.dot(x32, w1.astype(jnp.float32), precision=hi)
                    + b1.astype(jnp.float32), 0.0)
    y = jnp.dot(h, w2.astype(jnp.float32), precision=hi) + b2.astype(jnp.float32) + x32
    mean = jnp.mean(y, axis=-1, keepdims=True)
    var = jnp.mean((y - mean) ** 2, axis=-1, keepdims=True)
    return ((y - mean) / jnp.sqrt(var + LN_EPS)) * gamma.astype(jnp.float32) \
        + beta.astype(jnp.float32)


def _run_case(key, B, S, D, Hd, *, dtype=jnp.float32, tol=2e-2, **kw):
    kx, k1, k2, k3, k4 = jax.random.split(key, 5)
    x = jax.random.normal(kx, (B, S, D), dtype=jnp.float32).astype(dtype)
    w1 = (jax.random.uniform(k1, (D, Hd), minval=-1.0, maxval=1.0) / jnp.sqrt(D)).astype(dtype)
    b1 = (jax.random.uniform(k2, (Hd,), minval=-1.0, maxval=1.0) / jnp.sqrt(D)).astype(dtype)
    w2 = (jax.random.uniform(k3, (Hd, D), minval=-1.0, maxval=1.0) / jnp.sqrt(Hd)).astype(dtype)
    b2 = (jax.random.uniform(k4, (D,), minval=-1.0, maxval=1.0) / jnp.sqrt(Hd)).astype(dtype)
    gamma = jnp.ones((D,), dtype=dtype)
    beta = jnp.zeros((D,), dtype=dtype)

    out = position_wise_feed_forward(x, w1, b1, w2, b2, gamma, beta, **kw)
    out = jax.block_until_ready(out)
    ref = _reference(x, w1, b1, w2, b2, gamma, beta)

    assert out.shape == (B, S, D)
    # MXU matmuls may run reduced-precision passes vs the HIGHEST-precision
    # reference, so the tolerance is deliberately loose but still catches
    # structural bugs (wrong bias / LN-over-padded-lanes would be O(1) off).
    diff = float(jnp.max(jnp.abs(out.astype(jnp.float32) - ref)))
    assert diff < tol, f"mismatch vs reference, max abs diff = {diff}"


if __name__ == "__main__":
    key = jax.random.PRNGKey(0)
    k_a, k_b, k_c = jax.random.split(key, 3)

    # Case 1: module-sized demo (D=32, H=64) — lane padding + masked LN;
    # auto tiling picks the resident-weights single-pass kernel.
    _run_case(k_a, B=2, S=8, D=32, Hd=64, tol=2e-2)

    # Case 2: force the H-chunked accumulator path (2 row tiles x 2 H chunks).
    _run_case(k_b, B=2, S=64, D=128, Hd=256, tol=2e-2, tm=64, h_chunk=128)

    # Case 3: lane-aligned bf16 path (native bf16 MXU feed), resident weights,
    # 2 row tiles on the "parallel" axis.
    _run_case(k_c, B=1, S=256, D=128, Hd=512, dtype=jnp.bfloat16, tol=6e-2)

    print("KERNEL_OK")
</pallas_src>

<mosaic_0001>
module attributes {stable_mosaic.version = 11 : i64} {
  func.func @ffn_resident_kernel(%arg0: i32, %arg1: memref<8x128xf32, #tpu.memory_space<vmem>>, %arg2: memref<128x128xf32, #tpu.memory_space<vmem>>, %arg3: memref<1x128xf32, #tpu.memory_space<vmem>>, %arg4: memref<128x128xf32, #tpu.memory_space<vmem>>, %arg5: memref<1x128xf32, #tpu.memory_space<vmem>>, %arg6: memref<1x128xf32, #tpu.memory_space<vmem>>, %arg7: memref<1x128xf32, #tpu.memory_space<vmem>>, %arg8: memref<8x128xf32, #tpu.memory_space<vmem>>) attributes {dimension_semantics = [#tpu.dimension_semantics<parallel>], iteration_bounds = array<i64: 2>, scalar_prefetch = 0 : i64, scratch_operands = 0 : i64, tpu.core_type = #tpu.core_type<tc>, window_params = [{transform_indices = @transform_0, window_bounds = array<i64: 8, 128>}, {pipeline_mode = #tpu.pipeline_mode<synchronous>, transform_indices = @transform_1, window_bounds = array<i64: 128, 128>}, {pipeline_mode = #tpu.pipeline_mode<synchronous>, transform_indices = @transform_2, window_bounds = array<i64: 1, 128>}, {pipeline_mode = #tpu.pipeline_mode<synchronous>, transform_indices = @transform_3, window_bounds = array<i64: 128, 128>}, {pipeline_mode = #tpu.pipeline_mode<synchronous>, transform_indices = @transform_4, window_bounds = array<i64: 1, 128>}, {pipeline_mode = #tpu.pipeline_mode<synchronous>, transform_indices = @transform_5, window_bounds = array<i64: 1, 128>}, {pipeline_mode = #tpu.pipeline_mode<synchronous>, transform_indices = @transform_6, window_bounds = array<i64: 1, 128>}, {transform_indices = @transform_7, window_bounds = array<i64: 8, 128>}]} {
    %c0 = arith.constant 0 : index
    %c0_0 = arith.constant 0 : index
    %0 = vector.load %arg1[%c0, %c0_0] : memref<8x128xf32, #tpu.memory_space<vmem>>, vector<8x128xf32>
    %c0_1 = arith.constant 0 : index
    %c0_2 = arith.constant 0 : index
    %1 = vector.load %arg2[%c0_1, %c0_2] : memref<128x128xf32, #tpu.memory_space<vmem>>, vector<128x128xf32>
    %cst = arith.constant dense<0.000000e+00> : vector<8x128xf32>
    %2 = tpu.matmul %0, %1, %cst {dimension_numbers = #tpu.dot_dimension_numbers<[1], [0], [0], [1], [0, 0, 1, 1], [], []>} : vector<8x128xf32>, vector<128x128xf32>, vector<8x128xf32> -> vector<8x128xf32>
    %c0_3 = arith.constant 0 : index
    %c0_4 = arith.constant 0 : index
    %3 = vector.load %arg3[%c0_3, %c0_4] : memref<1x128xf32, #tpu.memory_space<vmem>>, vector<1x128xf32>
    %4 = vector.broadcast %3 : vector<1x128xf32> to vector<8x128xf32>
    %5 = arith.addf %2, %4 : vector<8x128xf32>
    %cst_5 = arith.constant 0.000000e+00 : f32
    %6 = vector.broadcast %cst_5 : f32 to vector<8x128xf32>
    %7 = arith.maximumf %5, %6 : vector<8x128xf32>
    %c0_6 = arith.constant 0 : index
    %c0_7 = arith.constant 0 : index
    %8 = vector.load %arg4[%c0_6, %c0_7] : memref<128x128xf32, #tpu.memory_space<vmem>>, vector<128x128xf32>
    %cst_8 = arith.constant dense<0.000000e+00> : vector<8x128xf32>
    %9 = tpu.matmul %7, %8, %cst_8 {dimension_numbers = #tpu.dot_dimension_numbers<[1], [0], [0], [1], [0, 0, 1, 1], [], []>} : vector<8x128xf32>, vector<128x128xf32>, vector<8x128xf32> -> vector<8x128xf32>
    %c0_9 = arith.constant 0 : index
    %c0_10 = arith.constant 0 : index
    %10 = vector.load %arg5[%c0_9, %c0_10] : memref<1x128xf32, #tpu.memory_space<vmem>>, vector<1x128xf32>
    %11 = vector.broadcast %10 : vector<1x128xf32> to vector<8x128xf32>
    %12 = arith.addf %9, %11 : vector<8x128xf32>
    %13 = arith.addf %12, %0 : vector<8x128xf32>
    %c0_11 = arith.constant 0 : index
    %c0_12 = arith.constant 0 : index
    %14 = vector.load %arg6[%c0_11, %c0_12] : memref<1x128xf32, #tpu.memory_space<vmem>>, vector<1x128xf32>
    %c0_13 = arith.constant 0 : index
    %c0_14 = arith.constant 0 : index
    %15 = vector.load %arg7[%c0_13, %c0_14] : memref<1x128xf32, #tpu.memory_space<vmem>>, vector<1x128xf32>
    %16 = tpu.iota {dimensions = array<i32: 1>} : vector<8x128xi32>
    %c32_i32 = arith.constant 32 : i32
    %17 = vector.broadcast %c32_i32 : i32 to vector<8x128xi32>
    %18 = arith.cmpi slt, %16, %17 : vector<8x128xi32>
    %cst_15 = arith.constant 0.000000e+00 : f32
    %19 = vector.broadcast %cst_15 : f32 to vector<8x128xf32>
    %20 = arith.select %18, %13, %19 : vector<8x128xi1>, vector<8x128xf32>
    %cst_16 = arith.constant dense<0.000000e+00> : vector<8xf32>
    %21 = vector.multi_reduction <add>, %20, %cst_16 [1] : vector<8x128xf32> to vector<8xf32>
    %22 = vector.shape_cast %21 : vector<8xf32> to vector<8x1xf32>
    %cst_17 = arith.constant 3.200000e+01 : f32
    %23 = vector.broadcast %cst_17 : f32 to vector<8x1xf32>
    %24 = arith.divf %22, %23 : vector<8x1xf32>
    %25 = vector.broadcast %24 : vector<8x1xf32> to vector<8x128xf32>
    %26 = arith.subf %13, %25 : vector<8x128xf32>
    %cst_18 = arith.constant 0.000000e+00 : f32
    %27 = vector.broadcast %cst_18 : f32 to vector<8x128xf32>
    %28 = arith.select %18, %26, %27 : vector<8x128xi1>, vector<8x128xf32>
    %29 = arith.mulf %28, %28 : vector<8x128xf32>
    %cst_19 = arith.constant dense<0.000000e+00> : vector<8xf32>
    %30 = vector.multi_reduction <add>, %29, %cst_19 [1] : vector<8x128xf32> to vector<8xf32>
    %31 = vector.shape_cast %30 : vector<8xf32> to vector<8x1xf32>
    %cst_20 = arith.constant 3.200000e+01 : f32
    %32 = vector.broadcast %cst_20 : f32 to vector<8x1xf32>
    %33 = arith.divf %31, %32 : vector<8x1xf32>
    %cst_21 = arith.constant 9.99999974E-6 : f32
    %34 = vector.broadcast %cst_21 : f32 to vector<8x1xf32>
    %35 = arith.addf %33, %34 : vector<8x1xf32>
    %36 = math.rsqrt %35 : vector<8x1xf32>
    %37 = vector.broadcast %36 : vector<8x1xf32> to vector<8x128xf32>
    %38 = arith.mulf %28, %37 : vector<8x128xf32>
    %39 = vector.broadcast %14 : vector<1x128xf32> to vector<8x128xf32>
    %40 = arith.mulf %38, %39 : vector<8x128xf32>
    %41 = vector.broadcast %15 : vector<1x128xf32> to vector<8x128xf32>
    %42 = arith.addf %40, %41 : vector<8x128xf32>
    %c0_22 = arith.constant 0 : index
    %c0_23 = arith.constant 0 : index
    %43 = vector.load %arg8[%c0_22, %c0_23] : memref<8x128xf32, #tpu.memory_space<vmem>>, vector<8x128xf32>
    tpu.vector_store %arg8[%c0_22, %c0_23], %42 {strides = array<i32>} : memref<8x128xf32, #tpu.memory_space<vmem>>, vector<8x128xf32>,
    return
  }
  func.func @transform_0(%arg0: i32) -> (i32, i32) {
    %c0_i32 = arith.constant 0 : i32
    %c0_i32_0 = arith.constant 0 : i32
    return %arg0, %c0_i32 : i32, i32
  }
  func.func @transform_1(%arg0: i32) -> (i32, i32) {
    %c0_i32 = arith.constant 0 : i32
    %c0_i32_0 = arith.constant 0 : i32
    %c0_i32_1 = arith.constant 0 : i32
    return %c0_i32, %c0_i32_0 : i32, i32
  }
  func.func @transform_2(%arg0: i32) -> (i32, i32) {
    %c0_i32 = arith.constant 0 : i32
    %c0_i32_0 = arith.constant 0 : i32
    %c0_i32_1 = arith.constant 0 : i32
    return %c0_i32, %c0_i32_0 : i32, i32
  }
  func.func @transform_3(%arg0: i32) -> (i32, i32) {
    %c0_i32 = arith.constant 0 : i32
    %c0_i32_0 = arith.constant 0 : i32
    %c0_i32_1 = arith.constant 0 : i32
    return %c0_i32, %c0_i32_0 : i32, i32
  }
  func.func @transform_4(%arg0: i32) -> (i32, i32) {
    %c0_i32 = arith.constant 0 : i32
    %c0_i32_0 = arith.constant 0 : i32
    %c0_i32_1 = arith.constant 0 : i32
    return %c0_i32, %c0_i32_0 : i32, i32
  }
  func.func @transform_5(%arg0: i32) -> (i32, i32) {
    %c0_i32 = arith.constant 0 : i32
    %c0_i32_0 = arith.constant 0 : i32
    %c0_i32_1 = arith.constant 0 : i32
    return %c0_i32, %c0_i32_0 : i32, i32
  }
  func.func @transform_6(%arg0: i32) -> (i32, i32) {
    %c0_i32 = arith.constant 0 : i32
    %c0_i32_0 = arith.constant 0 : i32
    %c0_i32_1 = arith.constant 0 : i32
    return %c0_i32, %c0_i32_0 : i32, i32
  }
  func.func @transform_7(%arg0: i32) -> (i32, i32) {
    %c0_i32 = arith.constant 0 : i32
    %c0_i32_0 = arith.constant 0 : i32
    return %arg0, %c0_i32 : i32, i32
  }
}

</mosaic_0001>

<bundles_post_ra>
// kernel: tpu_custom_call.1
= control target key start
LH: loop header
LB: loop body
LE: loop exit
PB: predicated region body
PF: predicated region fallthrough
CT: control target
= control target key end

     0   :  { %s1262_s0 = inlined_call_operand.hbm [shape: f32[16,128], index: 0, kind: input, shape index: {}]   ;;  %s1263_s1 = inlined_call_operand.hbm [shape: f32[128,128], index: 1, kind: input, shape index: {}]   ;;  %s1264_s2 = inlined_call_operand.vmem [shape: f32[1,128], index: 2, kind: input, shape index: {}]   ;;  %s1265_s3 = inlined_call_operand.hbm [shape: f32[128,128], index: 3, kind: input, shape index: {}]   ;;  %s1266_s4 = inlined_call_operand.vmem [shape: f32[1,128], index: 4, kind: input, shape index: {}]   ;;  %s1267_s5 = inlined_call_operand.vmem [shape: f32[1,128], index: 5, kind: input, shape index: {}]   ;;  %s1268_s6 = inlined_call_operand.vmem [shape: f32[1,128], index: 6, kind: input, shape index: {}]   ;;  %s1269_s7 = inlined_call_operand.hbm [shape: f32[16,128], index: 7, kind: output, shape index: {}]  }
   0x1   :  { %1274 = sst [smem:[#allocation12_spill]] %s1263_s1 }
   0x2   :  { %1275 = sst [smem:[#allocation13_spill]] %s1265_s3 }
   0x3   :  { %12 = vsyncpa [#allocation3], 0 }
   0x4   :  { %14 = vsyncpa [#allocation3 + $0x1], 0 }
   0x5   :  { %15 = vsyncpa [#allocation6], 0 }
   0x6   :  { %16 = vsyncpa [#allocation4], 0 }
   0x7   :  { %18 = vsyncpa [#allocation4 + $0x1], 0  ;;  %s1044_s24 = smov 0   ;;  %s1046_s25 = smov 0  }
   0x8   :  { %s1048_s26 = smov 0   ;;  %s1050_s27 = smov 0  }
   0x9 LB: > { %s1065_s28 = sadd.s32 4294967295, %s994_s27   ;;  %s649_s29 = sadd.s32 4294967294, %s994_s27   ;;  %s994_s27 = sphi %s1050_s27, %s1295_s27   ;;  %s990_s26 = sphi %s1048_s26, %s1294_s26   ;;  %s986_s25 = sphi %s1046_s25, %s1293_s25   ;;  %s982_s24 = sphi %s1044_s24, %s1292_s24  }
   0xa   : > { %p44_p0 = scmp.ne.s32.totalorder %s986_s25, %s982_s24  ;;  %p1270_p1 = scmp.eq.s32.totalorder %s1065_s28, 0 }
   0xb   : > { %p200_p3 = scmp.eq.s32.totalorder %s649_s29, 1  ;;  %p650_p5 = scmp.ge.s32.totalorder %s994_s27, 1 }
   0xc   : > { %p1074_p4 = por %p1270_p1, %p44_p0  ;;  %p207_p7 = scmp.lt.s32.totalorder %s994_s27, 3 }
   0xd   : > { %p1079_p6 = por %p200_p3, %p44_p0  ;;  %s996_s10 = smov [#allocation5]  }
   0xe   : > { %s1276_s30 = scalar_select %p1074_p4, 1, 0 }
   0xf   : > { %s1277_s8 = scalar_select %p1079_p6, 1, 0 }
  0x10   : > { %p1084_p8 = pnand %p650_p5, %p207_p7  ;;  %s219_s11 = sshll.u32 %s996_s10, 4  ;;  %s220_s11 = int_to_ptr.vmem [resolvable:$true] %s219_s11 }
  0x11   : > { %s997_s13 = smov [#allocation7]   ;;  %s857_s15 = scalar_lea.vmem %s220_s11, 2048 }
  0x12   : > { %s1278_s9 = scalar_select %p1084_p8, 1, 0 }
  0x13   : > { %p785_p9 = pneg %p1084_p8  ;;  %s235_s14 = sshll.u32 %s997_s13, 4  ;;  %s236_s14 = int_to_ptr.vmem [resolvable:$true] %s235_s14 }
  0x14   : > { %p858_p13 = scmp.ne.s32.totalorder %s220_s11, %s857_s15  ;;  %p865_p5 = scmp.lt.s32.totalorder %s220_s11, %s220_s11 }
  0x15   : > { %p1093_p11 = pnand %p785_p9, %p1270_p1  ;;  %p866_p7 = scmp.lt.s32.totalorder %s857_s15, %s857_s15 }
  0x17   : > { %p848_p12 = pneg %p1093_p11  ;;  %p867_p10 = por %p866_p7, %p865_p5 }
  0x19   : > { %p860_p0 = pnand %p858_p13, %p848_p12 }
  0x1b   : > { %p861_p3 = pneg %p860_p0 }
  0x1d   : > { %p868_p9 = pnand %p867_p10, %p861_p3 }
  0x1f   : > { %871 = shalt.err (!%p868_p9)
}
  0x20   : > { %s998_s16 = smov 128   ;;  %s999_s17 = smov 8  }
  0x21   : > { %s1280_s1 = sld [smem:[#allocation12_spill]]  ;;  %s883_s20 = scalar_lea.vmem %s236_s14, 2048 }
  0x22   : > { %p884_p1 = scmp.ne.s32.totalorder %s236_s14, %s883_s20  ;;  %p891_p2 = scmp.lt.s32.totalorder %s236_s14, %s236_s14 }
  0x23   : > { %p892_p6 = scmp.lt.s32.totalorder %s883_s20, %s883_s20 }
  0x24   : > { %p886_p13 = pnand %p884_p1, %p848_p12 }
  0x25   : > { %p893_p5 = por %p892_p6, %p891_p2 }
  0x26   : > { %p887_p0 = pneg %p886_p13 }
  0x27   : > { %788 = dma.hbm_to_vmem [thread:$0]  (!%p1093_p11), %s1280_s1, 2048, %s220_s11, [#allocation6], %s998_s16, %s998_s16, %s999_s17  }
  0x28   : > { %p894_p10 = pnand %p893_p5, %p887_p0 }
  0x2a   : > { %897 = shalt.err (!%p894_p10)
}
  0x2b   : > { %s1281_s3 = sld [smem:[#allocation13_spill]]  ;;  %s1116_s23 = sadd.s32 1, %s994_s27  }
  0x2c   : > { %s31_s29 = sadd.s32 1, %s990_s26  ;;  %s28_s10 = ssub.s32 %s994_s27, %s1116_s23 }
  0x2d   : > { %p38_p1 = scmp.ne.s32.totalorder %s990_s26, %s986_s25  ;;  %p29_p2 = scmp.eq.s32.totalorder %s28_s10, 0 }
  0x2e   : > { %p39_p6 = scmp.eq.s32.totalorder %s994_s27, 0  ;;  %p1282_p12 = scmp.eq.s32.totalorder %s1065_s28, 1 }
  0x2f   : > { %p802_p7 = scmp.lt.s32.totalorder %s994_s27, 2  ;;  %s258_s13 = sand.u32 1, %s990_s26  }
  0x30   : > { %p1126_p3 = por %p1282_p12, %p38_p1  ;;  %p40_p9 = por %p39_p6, %p38_p1 }
  0x31   : > { %791 = dma.hbm_to_vmem [thread:$0]  (!%p1093_p11), %s1281_s3, 2048, %s236_s14, [#allocation6], %s998_s16, %s998_s16, %s999_s17  }
  0x32   : > { %s1283_s11 = scalar_select %p1126_p3, 1, 0 }
  0x33   : > { %s1132_s12 = scalar_select %p29_p2, %s990_s26, %s31_s29  }
  0x34   : > { %s654_s15 = sshll.u32 %s258_s13, 3  ;;  %s655_s14 = sshll.u32 %s994_s27, 7 }
  0x35   : > { %s1139_s18 = scalar_lea.hbm %s1262_s0, %s655_s14  ;;  %s262_s19 = scalar_lea.vmem [#allocation2], %s654_s15 }
  0x36   : > { %s269_s20 = sshll.u32 %s262_s19, 4  ;;  %p1141_p11 = pnand %p802_p7, %p40_p9  ;;  %s270_s20 = int_to_ptr.vmem [resolvable:$true] %s269_s20 }
  0x37   : > { %s259_s22 = scalar_lea.sflag [#allocation3], %s258_s13  ;;  %s898_s29 = scalar_lea.hbm %s1139_s18, 128 }
  0x38   : > { %p899_p13 = scmp.ne.s32.totalorder %s1139_s18, %s898_s29  ;;  %p900_p0 = pneg %p1141_p11 }
  0x39   : > { %s903_s16 = scalar_lea.hbm %s1262_s0, 256  ;;  %p904_p1 = scmp.lt.s32.totalorder %s1139_s18, %s1262_s0 }
  0x3a   : > { %p901_p5 = pnand %p900_p0, %p899_p13  ;;  %p905_p2 = scmp.lt.s32.totalorder %s903_s16, %s898_s29 }
  0x3c   : > { %p902_p10 = pneg %p901_p5  ;;  %p906_p6 = por %p905_p2, %p904_p1 }
  0x3e   : > { %p907_p12 = pnand %p906_p6, %p902_p10 }
  0x40   : > { %910 = shalt.err (!%p907_p12)
}
  0x41   : > { %s911_s19 = scalar_lea.vmem %s270_s20, 128  ;;  %s1000_s13 = smov [#allocation2]  }
  0x42   : > { %p912_p7 = scmp.ne.s32.totalorder %s270_s20, %s911_s19  ;;  %s916_s1 = sshll.u32 %s1000_s13, 4  ;;  %s917_s1 = int_to_ptr.vmem [resolvable:$false] %s916_s1 }
  0x43   : > { %s918_s3 = scalar_lea.vmem %s917_s1, 256  ;;  %p919_p13 = scmp.lt.s32.totalorder %s270_s20, %s917_s1 }
  0x44   : > { %p914_p9 = pnand %p912_p7, %p900_p0  ;;  %p920_p5 = scmp.lt.s32.totalorder %s918_s3, %s911_s19 }
  0x46   : > { %p915_p3 = pneg %p914_p9  ;;  %p921_p4 = por %p920_p5, %p919_p13 }
  0x48   : > { %p922_p8 = pnand %p921_p4, %p915_p3 }
  0x4a   : > { %925 = shalt.err (!%p922_p8)
}
  0x4b   : > { %795 = dma.hbm_to_vmem [thread:$0]  (!%p1141_p11), %s1139_s18, 128, %s270_s20, %s259_s22  }
  0x4c   : > { %p1285_p10 = scmp.ne.s32.totalorder %s1278_s9, 0 }
  0x4d   : > { %s1162_s29 = sand.u32 (!%p1285_p10), 1, %s986_s25   ;;  %p1286_p4 = scmp.ne.s32.totalorder (!%p1285_p10), %s1276_s30, 0 }
  0x4e   : > { %278 = sbr.rel (%p1285_p10) target bundleno = 836 (0x344), region = 48  ;;  %s657_s10 = sshll.u32 (!%p1285_p10), %s1162_s29, 3 }
  0x4f   : > { %s281_s1 = scalar_lea.sflag (!%p1285_p10), [#allocation3], %s1162_s29  ;;  %s1168_s3 = scalar_lea.vmem (!%p1285_p10), [#allocation2], %s657_s10 }
  0x53   : > { %969 = dma.done.wait (%p1286_p4), %s281_s1, 128  }
  0x54   : > { %971 = vsyncadd (%p1286_p4), %s281_s1, 4294967168  ;;  %p1287_p8 = scmp.eq.s32.totalorder %s1065_s28, 0 }
  0x56   : > { %973 = dma.done.wait (%p1287_p8), [#allocation6], 4096   ;;  %p1288_p3 = pmov %p1287_p8 }
  0x57   : > { %v1001_v0 = vmov 0.0   ;;  %vm1002_vm0 = vmmov 0   ;;  %v339_v1 = vld [vmem:[#allocation5 + $0x78] sm:$0xff]  ;;  %v338_v2 = vld [vmem:[#allocation5 + $0x70] sm:$0xff]  ;;  %v337_v3 = vld [vmem:[#allocation5 + $0x68] sm:$0xff]  ;;  %v514_v39 = vlaneseq  ;;  %s666_s17 = sshll.u32 %s1065_s28, 7 }
  0x58   : > { %975 = vsyncadd (%p1288_p3), [#allocation6], 4294963200  ;;  %703 = vmatprep.subr.mxu0 %v1001_v0  ;;  %735 = vmatprep.mubr.msk.f32.mxu0 %vm1002_vm0, %v1001_v0  ;;  %v336_v4 = vld [vmem:[#allocation5 + $0x60] sm:$0xff]  ;;  %v433_v5 = vld [vmem:[#allocation7 + $0x78] sm:$0xff]  ;;  %s322_s15 = scalar_lea.vmem [#allocation8], %s657_s10  ;;  %s547_s30 = scalar_lea.sflag [#allocation4], %s1162_s29 }
  0x59   : > { %738 = vmatprep.subr.mxu1 %v1001_v0  ;;  %770 = vmatprep.mubr.msk.f32.mxu1 %vm1002_vm0, %v1001_v0  ;;  %v335_v6 = vld [vmem:[#allocation5 + $0x58] sm:$0xff]  ;;  %v432_v7 = vld [vmem:[#allocation7 + $0x70] sm:$0xff]  ;;  %v431_v8 = vld [vmem:[#allocation7 + $0x68] sm:$0xff]  ;;  %v515_v41 = vand.u32 127, %v514_v39  ;;  %s560_s19 = sshll.u32 %s322_s15, 4  ;;  %p1289_p0 = scmp.ne.s32.totalorder %s1283_s11, 0  ;;  %s561_s19 = int_to_ptr.vmem [resolvable:$true] %s560_s19 }
  0x5a   : > { %704 = vmatpush3.msra.mxu0 %v339_v1  ;;  %739 = vmatpush3.msra.mxu1 %v433_v5  ;;  %v334_v9 = vld [vmem:[#allocation5 + $0x50] sm:$0xff]  ;;  %v430_v10 = vld [vmem:[#allocation7 + $0x60] sm:$0xff]  ;;  %v333_v11 = vld [vmem:[#allocation5 + $0x48] sm:$0xff]  ;;  %s926_s9 = scalar_lea.vmem %s561_s19, 128  ;;  %s1003_s18 = smov [#allocation8]  }
  0x5b   : > { %705 = vmatprep.subr.mxu0 %v1001_v0  ;;  %740 = vmatprep.subr.mxu1 %v1001_v0  ;;  %v429_v12 = vld [vmem:[#allocation7 + $0x58] sm:$0xff]  ;;  %v332_v13 = vld [vmem:[#allocation5 + $0x40] sm:$0xff]  ;;  %v428_v14 = vld [vmem:[#allocation7 + $0x50] sm:$0xff]  ;;  %vm516_vm1 = vcmp.lt.s32.totalorder %v515_v41, 32  ;;  %p927_p11 = scmp.ne.s32.totalorder %s561_s19, %s926_s9  ;;  %s930_s20 = sshll.u32 %s1003_s18, 4  ;;  %s931_s20 = int_to_ptr.vmem [resolvable:$false] %s930_s20 }
  0x5c   : > { %706 = vmatpush3.msra.mxu0 %v338_v2  ;;  %741 = vmatpush3.msra.mxu1 %v432_v7  ;;  %v331_v15 = vld [vmem:[#allocation5 + $0x38] sm:$0xff]  ;;  %v427_v16 = vld [vmem:[#allocation7 + $0x48] sm:$0xff]  ;;  %v330_v17 = vld [vmem:[#allocation5 + $0x30] sm:$0xff]  ;;  %s932_s28 = scalar_lea.vmem %s931_s20, 256  ;;  %p933_p6 = scmp.lt.s32.totalorder %s561_s19, %s931_s20 }
  0x5d   : > { %707 = vmatprep.subr.mxu0 %v1001_v0  ;;  %742 = vmatprep.subr.mxu1 %v1001_v0  ;;  %v426_v18 = vld [vmem:[#allocation7 + $0x40] sm:$0xff]  ;;  %v329_v19 = vld [vmem:[#allocation5 + $0x28] sm:$0xff]  ;;  %v425_v20 = vld [vmem:[#allocation7 + $0x38] sm:$0xff]  ;;  %p928_p1 = pnand %p927_p11, %p1289_p0  ;;  %p934_p12 = scmp.lt.s32.totalorder %s932_s28, %s926_s9 }
  0x5e   : > { %708 = vmatpush3.msra.mxu0 %v337_v3  ;;  %743 = vmatpush3.msra.mxu1 %v431_v8  ;;  %v328_v21 = vld [vmem:[#allocation5 + $0x20] sm:$0xff]  ;;  %v424_v22 = vld [vmem:[#allocation7 + $0x30] sm:$0xff]  ;;  %v327_v23 = vld [vmem:[#allocation5 + $0x18] sm:$0xff] }
  0x5f   : > { %709 = vmatprep.subr.mxu0 %v1001_v0  ;;  %744 = vmatprep.subr.mxu1 %v1001_v0  ;;  %v423_v24 = vld [vmem:[#allocation7 + $0x28] sm:$0xff]  ;;  %v326_v25 = vld [vmem:[#allocation5 + $0x10] sm:$0xff]  ;;  %v422_v26 = vld [vmem:[#allocation7 + $0x20] sm:$0xff]  ;;  %p929_p2 = pneg %p928_p1  ;;  %p935_p7 = por %p934_p12, %p933_p6 }
  0x60   : > { %710 = vmatpush3.msra.mxu0 %v336_v4  ;;  %745 = vmatpush3.msra.mxu1 %v430_v10  ;;  %v325_v27 = vld [vmem:[#allocation5 + $0x8] sm:$0xff]  ;;  %v421_v28 = vld [vmem:[#allocation7 + $0x18] sm:$0xff]  ;;  %v324_v29 = vld [vmem:[#allocation5] sm:$0xff] }
  0x61   : > { %711 = vmatprep.subr.mxu0 %v1001_v0  ;;  %746 = vmatprep.subr.mxu1 %v1001_v0  ;;  %v323_v30 = vld [vmem:[%s1168_s3] sm:$0xff]  ;;  %v419_v32 = vld [vmem:[#allocation7 + $0x8] sm:$0xff]  ;;  %v418_v33 = vld [vmem:[#allocation7] sm:$0xff]  ;;  %s558_s3 = scalar_lea.hbm %s1269_s7, %s666_s17  ;;  %p936_p9 = pnand %p935_p7, %p929_p2 }
  0x62   : > { %712 = vmatpush3.msra.mxu0 %v335_v6  ;;  %747 = vmatpush3.msra.mxu1 %v429_v12  ;;  %v420_v31 = vld [vmem:[#allocation7 + $0x10] sm:$0xff] }
  0x63   : > { %713 = vmatprep.subr.mxu0 %v1001_v0  ;;  %748 = vmatprep.subr.mxu1 %v1001_v0  ;;  %v661_v34 = vld [vmem:[%s1264_s2] ss:$0 sm:$0xff] }
  0x64   : > { %714 = vmatpush3.msra.mxu0 %v334_v9  ;;  %749 = vmatpush3.msra.mxu1 %v428_v14  ;;  %v662_v40 = vld [vmem:[%s1266_s4] ss:$0 sm:$0xff] }
  0x65   : > { %715 = vmatprep.subr.mxu0 %v1001_v0  ;;  %750 = vmatprep.subr.mxu1 %v1001_v0  ;;  %v663_v56 = vld [vmem:[%s1267_s5] ss:$0 sm:$0xff] }
  0x66   : > { %716 = vmatpush3.msra.mxu0 %v333_v11  ;;  %751 = vmatpush3.msra.mxu1 %v427_v16  ;;  %v664_v58 = vld [vmem:[%s1268_s6] ss:$0 sm:$0xff] }
  0x67   : > { %717 = vmatprep.subr.mxu0 %v1001_v0  ;;  %752 = vmatprep.subr.mxu1 %v1001_v0 }
  0x68   : > { %718 = vmatpush3.msra.mxu0 %v332_v13  ;;  %753 = vmatpush3.msra.mxu1 %v426_v18 }
  0x69   : > { %719 = vmatprep.subr.mxu0 %v1001_v0  ;;  %754 = vmatprep.subr.mxu1 %v1001_v0 }
  0x6a   : > { %720 = vmatpush3.msra.mxu0 %v331_v15  ;;  %755 = vmatpush3.msra.mxu1 %v425_v20 }
  0x6b   : > { %721 = vmatprep.subr.mxu0 %v1001_v0  ;;  %756 = vmatprep.subr.mxu1 %v1001_v0 }
  0x6c   : > { %722 = vmatpush3.msra.mxu0 %v330_v17  ;;  %757 = vmatpush3.msra.mxu1 %v424_v22 }
  0x6d   : > { %723 = vmatprep.subr.mxu0 %v1001_v0  ;;  %758 = vmatprep.subr.mxu1 %v1001_v0 }
  0x6e   : > { %724 = vmatpush3.msra.mxu0 %v329_v19  ;;  %759 = vmatpush3.msra.mxu1 %v423_v24 }
  0x6f   : > { %725 = vmatprep.subr.mxu0 %v1001_v0  ;;  %760 = vmatprep.subr.mxu1 %v1001_v0 }
  0x70   : > { %726 = vmatpush3.msra.mxu0 %v328_v21  ;;  %761 = vmatpush3.msra.mxu1 %v422_v26 }
  0x71   : > { %727 = vmatprep.subr.mxu0 %v1001_v0  ;;  %762 = vmatprep.subr.mxu1 %v1001_v0 }
  0x72   : > { %728 = vmatpush3.msra.mxu0 %v327_v23  ;;  %763 = vmatpush3.msra.mxu1 %v421_v28 }
  0x73   : > { %729 = vmatprep.subr.mxu0 %v1001_v0  ;;  %764 = vmatprep.subr.mxu1 %v1001_v0 }
  0x74   : > { %730 = vmatpush3.msra.mxu0 %v326_v25  ;;  %765 = vmatpush3.msra.mxu1 %v420_v31 }
  0x75   : > { %731 = vmatprep.subr.mxu0 %v1001_v0  ;;  %766 = vmatprep.subr.mxu1 %v1001_v0 }
  0x76   : > { %732 = vmatpush3.msra.mxu0 %v325_v27  ;;  %767 = vmatpush3.msra.mxu1 %v419_v32 }
  0x77   : > { %733 = vmatprep.subr.mxu0 %v1001_v0  ;;  %768 = vmatprep.subr.mxu1 %v1001_v0 }
  0x78   : > { %734 = vmatpush3.msra.mxu0 %v324_v29  ;;  %769 = vmatpush3.msra.mxu1 %v418_v33 }
  0x79   : > { %736 = vmatmul.mubr.f32.vlgmr.msra.gmra.mxu0 %v323_v30 }
 0x139   : > { %v413_v35 = vpop.f32.mrf.mxu0 }
 0x13a   : > { %v414_v36 = vadd.f32 %v661_v34, %v413_v35 }
 0x13b   : > { %v737_v37 = vpop.f32.mrf.mxu0 }
 0x13c   : > { %v417_v38 = vmax.f32 %v414_v36, 0.0 }
 0x13e   : > { %771 = vmatmul.mubr.f32.vlgmr.msra.gmra.mxu1 %v417_v38 }
 0x1fe   : > { %v507_v42 = vpop.f32.mrf.mxu1 }
 0x1ff   : > { %v508_v43 = vadd.f32 %v662_v40, %v507_v42 }
 0x200   : > { %v772_v44 = vpop.f32.mrf.mxu1 }
 0x201   : > { %v511_v45 = vadd.f32 %v508_v43, %v323_v30 }
 0x203   : > { %v517_v46 = vsel %vm516_vm1, %v511_v45, 0.0 }
 0x204   : > { %518 = vadd.xlane.f32.xlu0 %v517_v46 }
 0x28d   : > { %v519_v47 = vpop.xlane.xlu0 %518 }
 0x28e   : > { %v521_v48 = vmul.f32 0.03125, %v519_v47 }
 0x290   : > { %v522_v49 = vsub.f32 %v511_v45, %v521_v48 }
 0x292   : > { %v523_v50 = vsel %vm516_vm1, %v522_v49, 0.0 }
 0x293   : > { %v524_v51 = vmul.f32 %v523_v50, %v523_v50 }
 0x295   : > { %525 = vadd.xlane.f32.xlu0 %v524_v51 }
 0x31e   : > { %v526_v52 = vpop.xlane.xlu0 %525 }
 0x31f   : > { %v527_v53 = vmul.f32 0.03125, %v526_v52 }
 0x321   : > { %v528_v54 = vadd.f32 1e-05, %v527_v53 }
 0x323   : > { %844 = vrsqrt.f32 %v528_v54 }
 0x330   : > { %v845_v55 = vpop.eup %844 }
 0x331   : > { %v530_v57 = vmul.f32 %v845_v55, %v523_v50 }
 0x333   : > { %v537_v59 = vmul.f32 %v663_v56, %v530_v57 }
 0x335   : > { %v544_v60 = vadd.f32 %v664_v58, %v537_v59 }
 0x337   : > { %545 = vst [vmem:[%s322_s15] sm:$0xff] %v544_v60 }
 0x338   : > { %939 = shalt.err (!%p936_p9)
}
 0x339   : > { %s940_s10 = scalar_lea.hbm %s558_s3, 128  ;;  %s944_s22 = scalar_lea.hbm %s1269_s7, 256 }
 0x33a   : > { %p941_p13 = scmp.ne.s32.totalorder %s558_s3, %s940_s10  ;;  %p945_p4 = scmp.lt.s32.totalorder %s558_s3, %s1269_s7 }
 0x33b   : > { %p946_p8 = scmp.lt.s32.totalorder %s944_s22, %s940_s10 }
 0x33c   : > { %p942_p5 = pnand %p941_p13, %p1289_p0 }
 0x33d   : > { %p947_p3 = por %p946_p8, %p945_p4 }
 0x33e   : > { %p943_p10 = pneg %p942_p5 }
 0x340   : > { %p948_p11 = pnand %p947_p3, %p943_p10 }
 0x342   : > { %951 = shalt.err (!%p948_p11)
}
 0x343   : > { %783 = dma.vmem_to_hbm [thread:$0]  (%p1289_p0), %s561_s19, 128, %s558_s3, %s547_s30  }
 0x344 PF: > { %s572_s17 = sand.u32 1, %s982_s24   ;;  %p1290_p1 = scmp.ne.s32.totalorder %s1277_s8, 0 }
 0x345   : > { %p1291_p2 = scmp.ge.s32.totalorder %s994_s27, 2  ;;  %s573_s15 = scalar_lea.sflag [#allocation4], %s572_s17 }
 0x347   : > { %p797_p6 = pnand %p1291_p2, %p1290_p1 }
 0x349   : > { %p798_p12 = pneg %p797_p6 }
 0x34b   : > { %977 = dma.done.wait (%p798_p12), %s573_s15, 128  }
 0x34c   : > { %979 = vsyncadd (%p798_p12), %s573_s15, 4294967168  ;;  %p21_p7 = scmp.ge.s32.totalorder %s1116_s23, 4   ;;  %s1292_s24 = smov %s986_s25 }
 0x34d   : > { %s1293_s25 = smov %s990_s26  ;;  %s1294_s26 = smov %s1132_s12 }
 0x34e   : > { %s1295_s27 = smov %s1116_s23  ;;  %23 = sbr.rel (!%p21_p7) target bundleno = 9 (0x9), region = 101 }
 0x353   :  { %578 = vsyncpa [#allocation3], 1 }
 0x354   :  { %580 = vsyncpa [#allocation3 + $0x1], 1 }
 0x355   :  { %581 = vsyncpa [#allocation6], 1 }
 0x356   :  { %582 = vsyncpa [#allocation4], 1 }
 0x357   :  { %584 = vsyncpa [#allocation4 + $0x1], 1 }

</bundles_post_ra>
